<compile_context>
chip_gen: v5e
topology: v5e:2x2
jax: 0.10.0
libtpu: 0.0.40
codegen_flags: <defaults>
</compile_context>

<pallas_src>
import functools

import jax
import jax.numpy as jnp
from jax.experimental import pallas as pl
from jax.experimental.pallas import tpu as pltpu


def _affine_gather_kernel(band_ref, flat_ref, img_ref, out_ref, *scratch, compute_dtype):
    # band_ref : SMEM (2*num_n,) int32  [lo_chunk, hi_chunk] per output tile (prefetched)
    # flat_ref : VMEM (1, TN)    int32  source pixel index per output pixel (-1 -> fill 0)
    # img_ref  : VMEM (M, TK)           source-pixel chunk (band-clamped via index_map)
    # out_ref  : VMEM (M, TN)           output tile, resident across the K (chunk) axis
    # scratch  : optional [(M, TN) f32] accumulator (only when out dtype != f32)
    acc_ref = scratch[0] if scratch else out_ref
    n = pl.program_id(0)
    k = pl.program_id(1)
    num_k = pl.num_programs(1)
    TK = img_ref.shape[1]
    TN = flat_ref.shape[1]

    @pl.when(k == 0)
    def _():
        acc_ref[...] = jnp.zeros_like(acc_ref)

    lo = band_ref[2 * n]
    hi = band_ref[2 * n + 1]

    @pl.when((k >= lo) & (k <= hi))
    def _():
        # Fold k*TK into flat with a single (1, TN) op instead of adding it to the
        # (TK, TN) iota; invalid pixels carry -1 and never match any source row.
        flat_k = flat_ref[...] - k * TK
        src = jax.lax.broadcasted_iota(jnp.int32, (TK, TN), 0)
        sel = (src == flat_k).astype(compute_dtype)          # one-hot gather matrix
        acc_ref[...] += jnp.dot(img_ref[...].astype(compute_dtype), sel,
                                preferred_element_type=jnp.float32)

    if scratch:
        @pl.when(k == num_k - 1)
        def _():
            out_ref[...] = acc_ref[...].astype(out_ref.dtype)


def _make_theta(key, H, W, translate, angle, shear):
    """Sample v2.RandomAffine params (scale=1) and build torchvision's inverse affine
    matrix with center=(0,0). Returns (8,) f32 = [ia, ib, itx, ic, id, ity, 0, 0]."""
    assert len(shear) == 2, "only x-shear range supported (shear_y sampled only for 4-tuples)"
    k1, k2, k3, k4 = jax.random.split(key, 4)
    ang = jax.random.uniform(k1, (), minval=float(angle[0]), maxval=float(angle[1]))
    max_dx = float(translate[0]) * W
    max_dy = float(translate[1]) * H
    tx = jnp.round(jax.random.uniform(k2, (), minval=-max_dx, maxval=max_dx))
    ty = jnp.round(jax.random.uniform(k3, (), minval=-max_dy, maxval=max_dy))
    shx = jax.random.uniform(k4, (), minval=float(shear[0]), maxval=float(shear[1]))
    shy = jnp.float32(0.0)

    rot = jnp.deg2rad(ang)
    sx = jnp.deg2rad(shx)
    sy = jnp.deg2rad(shy)
    a = jnp.cos(rot - sy) / jnp.cos(sy)
    b = -jnp.cos(rot - sy) * jnp.tan(sx) / jnp.cos(sy) - jnp.sin(rot)
    c = jnp.sin(rot - sy) / jnp.cos(sy)
    d = -jnp.sin(rot - sy) * jnp.tan(sx) / jnp.cos(sy) + jnp.cos(rot)
    ia, ib, ic_, id_ = d, -b, -c, a
    itx = ia * (-tx) + ib * (-ty)
    ity = ic_ * (-tx) + id_ * (-ty)
    return jnp.stack([ia, ib, itx, ic_, id_, ity,
                      jnp.float32(0.0), jnp.float32(0.0)]).astype(jnp.float32)


def _inverse_flat_indices(theta, H, W):
    """Nearest source-pixel index per output pixel under the inverse affine map.
    Matches torchvision _gen_affine_grid + grid_sample(nearest, zeros, align_corners=False).
    Returns (HW,) int32; -1 means 'outside the image' (zero fill)."""
    ia, ib, itx, ic, idd, ity = (theta[i] for i in range(6))
    idx = jnp.arange(H * W, dtype=jnp.int32)
    col = (idx % W).astype(jnp.float32)
    row = (idx // W).astype(jnp.float32)
    xp = col - (W - 1) * 0.5
    yp = row - (H - 1) * 0.5
    x_src = ia * xp + ib * yp + itx + (W - 1) * 0.5
    y_src = ic * xp + idd * yp + ity + (H - 1) * 0.5
    ix = jnp.round(x_src).astype(jnp.int32)
    iy = jnp.round(y_src).astype(jnp.int32)
    valid = (ix >= 0) & (ix < W) & (iy >= 0) & (iy < H)
    return jnp.where(valid, iy * W + ix, -1)


def _affine_apply(image, theta, *, max_tn=2048, max_tk=512):
    N, C, H, W = image.shape
    M = N * C
    HW = H * W
    assert max_tn % 128 == 0 and max_tk % 128 == 0

    TN = HW if HW <= max_tn else max_tn      # == full dim or a multiple of 128
    TK = HW if HW <= max_tk else max_tk
    num_n = pl.cdiv(HW, TN)
    num_k = pl.cdiv(HW, TK)
    HW_n = num_n * TN
    HW_k = num_k * TK

    # Inverse-affine source index per output pixel (plain JAX, O(HW)); pad with -1.
    flat = _inverse_flat_indices(theta, H, W)
    flat_pad = jnp.full((HW_n,), -1, jnp.int32).at[:HW].set(flat)

    # Per-output-tile band [lo, hi] of source chunks actually referenced. Flattened 1-D
    # int32 so the SMEM footprint stays tiny (2-D SMEM pads to (8,128) tiles).
    flat2d = flat_pad.reshape(num_n, TN)
    valid = flat2d >= 0
    chunk = flat2d // TK
    lo = jnp.min(jnp.where(valid, chunk, num_k), axis=1)    # num_k => tile has no source
    hi = jnp.max(jnp.where(valid, chunk, -1), axis=1)       # -1    => tile has no source
    band = jnp.stack([lo, hi], axis=1).reshape(-1).astype(jnp.int32)    # (2*num_n,)

    # Lane-dense (M, HW) image; source axis zero-padded to a multiple of TK so padded
    # rows are finite zeros (and can never be selected since flat < HW anyway).
    img_flat = image.reshape(M, HW)
    if HW_k != HW:
        img_flat = jnp.pad(img_flat, ((0, 0), (0, HW_k - HW)))

    # One-hot weights (0/1) are exact in bf16; use the bf16 MXU path only when the image
    # itself is bf16 (f32 data would be rounded).
    # TODO(synk): images known to hold uint8-origin values (0..255) could use bf16 here
    # even when stored as f32 for ~4x MXU throughput on v6e/v7x.
    compute_dtype = jnp.bfloat16 if image.dtype == jnp.bfloat16 else jnp.float32
    use_acc_scratch = image.dtype != jnp.float32     # f32 accumulates directly into out_ref

    def img_index_map(n, k, band_ref):
        lo_n = band_ref[2 * n]
        hi_n = band_ref[2 * n + 1]
        blk = jnp.minimum(jnp.maximum(k, lo_n), hi_n)        # clamp into band: dedups DMA
        blk = jnp.minimum(jnp.maximum(blk, 0), num_k - 1)    # keep in range for empty tiles
        return (0, blk)

    scratch_shapes = [pltpu.VMEM((M, TN), jnp.float32)] if use_acc_scratch else []

    # VMEM budget derived from the actual block sizes (+ sel-build temporaries) with
    # headroom; stays well under v7x's 64 MiB physical VMEM for the default tiles.
    isz = image.dtype.itemsize
    est = (2 * M * TN * isz                                  # output block
           + (M * TN * 4 if use_acc_scratch else 0)          # f32 accumulator
           + 2 * M * TK * isz                                # double-buffered image chunk
           + 2 * TN * 4                                      # flat block
           + 4 * TK * TN * 4)                                # iota/compare/cast temporaries
    vmem_limit = int(min(96 * 2**20, max(32 * 2**20, int(est * 1.5))))

    kernel = functools.partial(_affine_gather_kernel, compute_dtype=compute_dtype)
    out_flat = pl.pallas_call(
        kernel,
        out_shape=jax.ShapeDtypeStruct((M, HW), image.dtype),
        grid_spec=pltpu.PrefetchScalarGridSpec(
            num_scalar_prefetch=1,                           # band table -> SMEM
            grid=(num_n, num_k),
            in_specs=[
                pl.BlockSpec((1, TN), lambda n, k, band_ref: (0, n)),   # flat indices
                pl.BlockSpec((M, TK), img_index_map),                   # image chunk
            ],
            out_specs=pl.BlockSpec((M, TN), lambda n, k, band_ref: (0, n)),
            scratch_shapes=scratch_shapes,
        ),
        compiler_params=pltpu.CompilerParams(
            dimension_semantics=("parallel", "arbitrary"),   # n across cores, k = reduction
            vmem_limit_bytes=vmem_limit,
        ),
    )(band, flat_pad.reshape(1, HW_n), img_flat)
    return out_flat.reshape(N, C, H, W)


def random_affine(image_and_cover, key, translate=(0.0, 0.0), angle=(0.0, 0.0),
                  shear=(0.0, 0.0)):
    """Equivalent of RandomAffine.forward: returns the affine-transformed image."""
    image, _cover_image = image_and_cover  # cover image unused, as in the PyTorch module
    _, _, H, W = image.shape
    # TODO(synk): parameter sampling uses jax.random instead of torch's RNG stream;
    # the distribution matches v2.RandomAffine.get_params but not its exact draws.
    theta = _make_theta(key, H, W, translate, angle, shear)
    return _affine_apply(image, theta)


def _reference(image, theta):
    """Pure-JAX reference of the same inverse-affine nearest gather (for validation)."""
    N, C, H, W = image.shape
    ia, ib, itx, ic, idd, ity = (theta[i] for i in range(6))
    col = jnp.arange(W, dtype=jnp.float32)[None, :]
    row = jnp.arange(H, dtype=jnp.float32)[:, None]
    xp = col - (W - 1) * 0.5
    yp = row - (H - 1) * 0.5
    x_src = ia * xp + ib * yp + itx + (W - 1) * 0.5
    y_src = ic * xp + idd * yp + ity + (H - 1) * 0.5
    ix = jnp.round(x_src).astype(jnp.int32)
    iy = jnp.round(y_src).astype(jnp.int32)
    valid = (ix >= 0) & (ix < W) & (iy >= 0) & (iy < H)
    flat = jnp.where(valid, iy * W + ix, 0)
    gathered = jnp.take(image.reshape(N, C, H * W), flat.reshape(-1), axis=2)
    gathered = gathered.reshape(N, C, H, W)
    return jnp.where(valid[None, None], gathered, 0).astype(image.dtype)


if __name__ == "__main__":
    key = jax.random.PRNGKey(0)
    k_img, k_cov, k_aff = jax.random.split(key, 3)

    translate, angle, shear = (0.1, 0.1), (-30.0, 30.0), (-10.0, 10.0)

    # Small NCHW inputs: batch=2, channels=4, spatial=16x16 (single-tile path).
    image = jax.random.uniform(k_img, (2, 4, 16, 16), dtype=jnp.float32)
    cover = jax.random.uniform(k_cov, (2, 4, 16, 16), dtype=jnp.float32)

    out = random_affine((image, cover), k_aff, translate=translate, angle=angle, shear=shear)
    jax.block_until_ready(out)
    assert out.shape == image.shape and out.dtype == image.dtype

    theta = _make_theta(k_aff, image.shape[2], image.shape[3], translate, angle, shear)
    ref = _reference(image, theta)
    assert jnp.allclose(out, ref, atol=1e-5), "Pallas output mismatch vs JAX reference (16x16)"

    # Second check exercising the tiled path: multi-tile grid, non-dividing HW (padded
    # source chunks + partial output block), band skipping and image-DMA dedup.
    k2_img, k2_aff = jax.random.split(jax.random.PRNGKey(1), 2)
    image2 = jax.random.uniform(k2_img, (1, 3, 48, 56), dtype=jnp.float32)
    theta2 = _make_theta(k2_aff, 48, 56, translate, angle, shear)
    out2 = _affine_apply(image2, theta2, max_tn=512, max_tk=256)
    jax.block_until_ready(out2)
    ref2 = _reference(image2, theta2)
    assert jnp.allclose(out2, ref2, atol=1e-5), "Pallas output mismatch vs JAX reference (48x56)"

    print("KERNEL_OK")
</pallas_src>

<mosaic_0001>
module attributes {stable_mosaic.version = 11 : i64} {
  func.func @_affine_gather_kernel(%arg0: i32, %arg1: i32, %arg2: memref<2xi32, #tpu.memory_space<smem>>, %arg3: memref<1x256xi32, #tpu.memory_space<vmem>>, %arg4: memref<8x256xf32, #tpu.memory_space<vmem>>, %arg5: memref<8x256xf32, #tpu.memory_space<vmem>>) attributes {dimension_semantics = [#tpu.dimension_semantics<parallel>, #tpu.dimension_semantics<arbitrary>], iteration_bounds = array<i64: 1, 1>, scalar_prefetch = 1 : i64, scratch_operands = 0 : i64, tpu.core_type = #tpu.core_type<tc>, window_params = [{transform_indices = @transform_0, window_bounds = array<i64: 1, 256>}, {transform_indices = @transform_1, window_bounds = array<i64: 8, 256>}, {transform_indices = @transform_2, window_bounds = array<i64: 8, 256>}]} {
    %c0_i32 = arith.constant 0 : i32
    %0 = arith.cmpi eq, %arg1, %c0_i32 : i32
    %1 = arith.extui %0 : i1 to i32
    %c0_i32_0 = arith.constant 0 : i32
    %2 = arith.cmpi ne, %1, %c0_i32_0 : i32
    scf.if %2 {
      %cst = arith.constant 0.000000e+00 : f32
      %15 = vector.broadcast %cst : f32 to vector<8x256xf32>
      %c0 = arith.constant 0 : index
      %c0_3 = arith.constant 0 : index
      %16 = vector.load %arg5[%c0, %c0_3] : memref<8x256xf32, #tpu.memory_space<vmem>>, vector<8x256xf32>
      tpu.vector_store %arg5[%c0, %c0_3], %15 {strides = array<i32>} : memref<8x256xf32, #tpu.memory_space<vmem>>, vector<8x256xf32>,
    } else {
    }
    %c2_i32 = arith.constant 2 : i32
    %3 = arith.muli %c2_i32, %arg0 : i32
    %4 = arith.index_cast %3 : i32 to index
    %5 = memref.load %arg2[%4] : memref<2xi32, #tpu.memory_space<smem>>
    %c2_i32_1 = arith.constant 2 : i32
    %6 = arith.muli %c2_i32_1, %arg0 : i32
    %c1_i32 = arith.constant 1 : i32
    %7 = arith.addi %6, %c1_i32 : i32
    %8 = arith.index_cast %7 : i32 to index
    %9 = memref.load %arg2[%8] : memref<2xi32, #tpu.memory_space<smem>>
    %10 = arith.cmpi sge, %arg1, %5 : i32
    %11 = arith.cmpi sle, %arg1, %9 : i32
    %12 = arith.andi %10, %11 : i1
    %13 = arith.extui %12 : i1 to i32
    %c0_i32_2 = arith.constant 0 : i32
    %14 = arith.cmpi ne, %13, %c0_i32_2 : i32
    scf.if %14 {
      %c0 = arith.constant 0 : index
      %c0_3 = arith.constant 0 : index
      %15 = vector.load %arg3[%c0, %c0_3] : memref<1x256xi32, #tpu.memory_space<vmem>>, vector<1x256xi32>
      %c256_i32 = arith.constant 256 : i32
      %16 = arith.muli %arg1, %c256_i32 : i32
      %17 = vector.broadcast %16 : i32 to vector<1x256xi32>
      %18 = arith.subi %15, %17 : vector<1x256xi32>
      %19 = tpu.iota {dimensions = array<i32: 0>} : vector<256x256xi32>
      %20 = vector.broadcast %18 : vector<1x256xi32> to vector<256x256xi32>
      %21 = arith.cmpi eq, %19, %20 : vector<256x256xi32>
      %22 = arith.extui %21 : vector<256x256xi1> to vector<256x256xi32>
      %23 = arith.sitofp %22 : vector<256x256xi32> to vector<256x256xf32>
      %c0_4 = arith.constant 0 : index
      %c0_5 = arith.constant 0 : index
      %24 = vector.load %arg5[%c0_4, %c0_5] : memref<8x256xf32, #tpu.memory_space<vmem>>, vector<8x256xf32>
      %c0_6 = arith.constant 0 : index
      %c0_7 = arith.constant 0 : index
      %25 = vector.load %arg4[%c0_6, %c0_7] : memref<8x256xf32, #tpu.memory_space<vmem>>, vector<8x256xf32>
      %cst = arith.constant dense<0.000000e+00> : vector<8x256xf32>
      %26 = tpu.matmul %25, %23, %cst {dimension_numbers = #tpu.dot_dimension_numbers<[1], [0], [0], [1], [0, 0, 1, 1], [], []>} : vector<8x256xf32>, vector<256x256xf32>, vector<8x256xf32> -> vector<8x256xf32>
      %27 = arith.addf %24, %26 : vector<8x256xf32>
      %c0_8 = arith.constant 0 : index
      %c0_9 = arith.constant 0 : index
      %28 = vector.load %arg5[%c0_8, %c0_9] : memref<8x256xf32, #tpu.memory_space<vmem>>, vector<8x256xf32>
      tpu.vector_store %arg5[%c0_8, %c0_9], %27 {strides = array<i32>} : memref<8x256xf32, #tpu.memory_space<vmem>>, vector<8x256xf32>,
    } else {
    }
    return
  }
  func.func @transform_0(%arg0: i32, %arg1: i32, %arg2: memref<2xi32, #tpu.memory_space<smem>>) -> (i32, i32) {
    %c0_i32 = arith.constant 0 : i32
    %c0_i32_0 = arith.constant 0 : i32
    return %c0_i32, %arg0 : i32, i32
  }
  func.func @transform_1(%arg0: i32, %arg1: i32, %arg2: memref<2xi32, #tpu.memory_space<smem>>) -> (i32, i32) {
    %c2_i32 = arith.constant 2 : i32
    %0 = arith.muli %c2_i32, %arg0 : i32
    %1 = arith.index_cast %0 : i32 to index
    %2 = memref.load %arg2[%1] : memref<2xi32, #tpu.memory_space<smem>>
    %c2_i32_0 = arith.constant 2 : i32
    %3 = arith.muli %c2_i32_0, %arg0 : i32
    %c1_i32 = arith.constant 1 : i32
    %4 = arith.addi %3, %c1_i32 : i32
    %5 = arith.index_cast %4 : i32 to index
    %6 = memref.load %arg2[%5] : memref<2xi32, #tpu.memory_space<smem>>
    %7 = arith.maxsi %arg1, %2 : i32
    %8 = arith.minsi %7, %6 : i32
    %c0_i32 = arith.constant 0 : i32
    %9 = arith.maxsi %8, %c0_i32 : i32
    %c0_i32_1 = arith.constant 0 : i32
    %10 = arith.minsi %9, %c0_i32_1 : i32
    %c0_i32_2 = arith.constant 0 : i32
    %c0_i32_3 = arith.constant 0 : i32
    return %c0_i32_2, %10 : i32, i32
  }
  func.func @transform_2(%arg0: i32, %arg1: i32, %arg2: memref<2xi32, #tpu.memory_space<smem>>) -> (i32, i32) {
    %c0_i32 = arith.constant 0 : i32
    %c0_i32_0 = arith.constant 0 : i32
    return %c0_i32, %arg0 : i32, i32
  }
}

</mosaic_0001>

<bundles_post_ra>
// kernel: tpu_custom_call.1
= control target key start
LH: loop header
LB: loop body
LE: loop exit
PB: predicated region body
PF: predicated region fallthrough
CT: control target
= control target key end

     0   :  { %s670_s15 = smov [#allocation3]   ;;  %s879_s0 = inlined_call_operand.hbm [shape: s32[2], index: 0, kind: input, shape index: {}]   ;;  %s880_s1 = inlined_call_operand.hbm [shape: s32[1,256], index: 1, kind: input, shape index: {}]   ;;  %s881_s2 = inlined_call_operand.hbm [shape: f32[8,256], index: 2, kind: input, shape index: {}]   ;;  %s882_s3 = inlined_call_operand.hbm [shape: f32[8,256], index: 3, kind: output, shape index: {}]  }
   0x1   :  { %s9_s14 = sshll.u32 %s879_s0, 4  ;;  %s10_s14 = int_to_ptr.hbm [resolvable:$true] %s9_s14 }
   0x2   :  { %12 = dma.hbm_to_smem %s10_s14, 16, %s670_s15, [#allocation2] }
   0x3   :  { %662 = dma.done.wait [#allocation2], 16 }
   0x4   :  { %663 = vsyncadd [#allocation2], 4294967280 }
   0x5   :  { %15 = sfence }
   0x6   :  { %16 = vsyncpa [#allocation5], 0 }
   0x7   :  { %17 = vsyncpa [#allocation8], 0 }
   0x8   :  { %18 = vsyncpa [#allocation6], 0  ;;  %s24_s18 = sshll.u32 %s880_s1, 4  ;;  %s671_s19 = smov [#allocation4]   ;;  %s25_s18 = int_to_ptr.hbm [resolvable:$true] %s24_s18 }
   0x9   :  { %s26_s20 = sshll.u32 %s671_s19, 4  ;;  %s50_s0 = sshll.u32 %s881_s2, 4  ;;  %s27_s20 = int_to_ptr.vmem [resolvable:$true] %s26_s20  ;;  %s51_s0 = int_to_ptr.hbm [resolvable:$true] %s50_s0 }
   0xa   :  { %29 = dma.hbm_to_vmem [thread:$0]  %s25_s18, 32, %s27_s20, [#allocation5]  }
   0xb   :  { %s672_s23 = smov [#allocation7]  }
   0xc   :  { %s52_s24 = sshll.u32 %s672_s23, 4  ;;  %s53_s24 = int_to_ptr.vmem [resolvable:$true] %s52_s24 }
   0xd   :  { %55 = dma.hbm_to_vmem [thread:$0]  %s51_s0, 256, %s53_s24, [#allocation8]  }
   0xe   :  { %664 = dma.done.wait [#allocation5], 32  }
   0xf   :  { %665 = vsyncadd [#allocation5], 4294967264 }
  0x10   :  { %666 = dma.done.wait [#allocation8], 256  }
  0x11   :  { %667 = vsyncadd [#allocation8], 4294967040  ;;  %s84_s25 = sld [smem:[#allocation3]]  ;;  %v673_v0 = vmov 0.0  }
  0x12   :  { %81 = vst [vmem:[#allocation9] sm:$0xff] %v673_v0  ;;  %s441_s1 = sld [smem:[#allocation3 + $0x1]] }
  0x13   :  { %82 = vst [vmem:[#allocation9 + $0x8] sm:$0xff] %v673_v0 }
  0x17   :  { %p442_p0 = scmp.le.s32.totalorder %s84_s25, 0 }
  0x18   :  { %p443_p1 = scmp.ge.s32.totalorder %s441_s1, 0 }
  0x1a   :  { %p89_p2 = pnand %p443_p1, %p442_p0 }
  0x1c   :  { %92 = sbr.rel (%p89_p2) target bundleno = 208 (0xd0), region = 25 }
  0x21   :  { %v93_v1 = vld [vmem:[#allocation4] sm:$0x3]  ;;  %v97_v2 = vlaneseq  ;;  %v674_v14 = vmov 1.0   ;;  %v326_v38 = vld [vmem:[#allocation7] sm:$0xff]  ;;  %v327_v39 = vld [vmem:[#allocation7 + $0x8] sm:$0xff] }
  0x22   :  { %v707_v4 = vperm.slane %v93_v1, 1  ;;  %v709_v5 = vperm.slane %v93_v1, 0  ;;  %v324_v41 = vld [vmem:[#allocation9] sm:$0xff]  ;;  %v325_v45 = vld [vmem:[#allocation9 + $0x8] sm:$0xff] }
  0x23   :  { %v705_v3 = vshrl.u32 %v97_v2, 7 }
  0x25   :  { %v113_v6 = vadd.s32 120, %v705_v3  ;;  %v129_v7 = vadd.s32 248, %v705_v3  ;;  %v112_v8 = vadd.s32 112, %v705_v3  ;;  %v128_v9 = vadd.s32 240, %v705_v3 }
  0x26   :  { %v111_v10 = vadd.s32 104, %v705_v3  ;;  %v127_v11 = vadd.s32 232, %v705_v3  ;;  %v110_v12 = vadd.s32 96, %v705_v3  ;;  %v126_v13 = vadd.s32 224, %v705_v3 }
  0x27   :  { %vm163_vm0 = vcmp.eq.s32.totalorder %v113_v6, %v707_v4  ;;  %vm195_vm1 = vcmp.eq.s32.totalorder %v129_v7, %v707_v4  ;;  %vm161_vm2 = vcmp.eq.s32.totalorder %v112_v8, %v707_v4  ;;  %vm193_vm3 = vcmp.eq.s32.totalorder %v128_v9, %v707_v4 }
  0x28   :  { %540 = vmatpush.msk.msra.mxu2 %vm163_vm0, %v674_v14  ;;  %556 = vmatpush.msk.msra.mxu3 %vm195_vm1, %v674_v14  ;;  %vm159_vm4 = vcmp.eq.s32.totalorder %v111_v10, %v707_v4  ;;  %vm162_vm5 = vcmp.eq.s32.totalorder %v113_v6, %v709_v5  ;;  %vm191_vm6 = vcmp.eq.s32.totalorder %v127_v11, %v707_v4  ;;  %v109_v15 = vadd.s32 88, %v705_v3 }
  0x29   :  { %508 = vmatpush.msk.msra.mxu0 %vm162_vm5, %v674_v14  ;;  %vm194_vm7 = vcmp.eq.s32.totalorder %v129_v7, %v709_v5  ;;  %vm160_vm8 = vcmp.eq.s32.totalorder %v112_v8, %v709_v5  ;;  %vm192_vm9 = vcmp.eq.s32.totalorder %v128_v9, %v709_v5  ;;  %v125_v16 = vadd.s32 216, %v705_v3 }
  0x2a   :  { %541 = vmatpush.msk.msra.mxu2 %vm161_vm2, %v674_v14  ;;  %557 = vmatpush.msk.msra.mxu3 %vm193_vm3, %v674_v14  ;;  %vm158_vm10 = vcmp.eq.s32.totalorder %v111_v10, %v709_v5  ;;  %vm157_vm11 = vcmp.eq.s32.totalorder %v110_v12, %v707_v4  ;;  %vm189_vm12 = vcmp.eq.s32.totalorder %v126_v13, %v707_v4  ;;  %v108_v17 = vadd.s32 80, %v705_v3 }
  0x2b   :  { %524 = vmatpush.msk.msra.mxu1 %vm194_vm7, %v674_v14  ;;  %509 = vmatpush.msk.msra.mxu0 %vm160_vm8, %v674_v14  ;;  %v124_v18 = vadd.s32 208, %v705_v3  ;;  %vm190_vm13 = vcmp.eq.s32.totalorder %v127_v11, %v709_v5  ;;  %vm156_vm14 = vcmp.eq.s32.totalorder %v110_v12, %v709_v5  ;;  %vm155_vm15 = vcmp.eq.s32.totalorder %v109_v15, %v707_v4 }
  0x2c   :  { %542 = vmatpush.msk.msra.mxu2 %vm159_vm4, %v674_v14  ;;  %558 = vmatpush.msk.msra.mxu3 %vm191_vm6, %v674_v14  ;;  %vm187_vm0 = vcmp.eq.s32.totalorder %v125_v16, %v707_v4  ;;  %v107_v19 = vadd.s32 72, %v705_v3  ;;  %v123_v20 = vadd.s32 200, %v705_v3  ;;  %vm188_vm1 = vcmp.eq.s32.totalorder %v126_v13, %v709_v5 }
  0x2d   :  { %525 = vmatpush.msk.msra.mxu1 %vm192_vm9, %v674_v14  ;;  %510 = vmatpush.msk.msra.mxu0 %vm158_vm10, %v674_v14  ;;  %vm154_vm2 = vcmp.eq.s32.totalorder %v109_v15, %v709_v5  ;;  %vm153_vm3 = vcmp.eq.s32.totalorder %v108_v17, %v707_v4  ;;  %vm185_vm4 = vcmp.eq.s32.totalorder %v124_v18, %v707_v4  ;;  %v106_v21 = vadd.s32 64, %v705_v3 }
  0x2e   :  { %543 = vmatpush.msk.msra.mxu2 %vm157_vm11, %v674_v14  ;;  %559 = vmatpush.msk.msra.mxu3 %vm189_vm12, %v674_v14  ;;  %v122_v22 = vadd.s32 192, %v705_v3  ;;  %vm186_vm5 = vcmp.eq.s32.totalorder %v125_v16, %v709_v5  ;;  %vm152_vm6 = vcmp.eq.s32.totalorder %v108_v17, %v709_v5  ;;  %vm151_vm7 = vcmp.eq.s32.totalorder %v107_v19, %v707_v4 }
  0x2f   :  { %526 = vmatpush.msk.msra.mxu1 %vm190_vm13, %v674_v14  ;;  %511 = vmatpush.msk.msra.mxu0 %vm156_vm14, %v674_v14  ;;  %vm183_vm8 = vcmp.eq.s32.totalorder %v123_v20, %v707_v4  ;;  %v105_v23 = vadd.s32 56, %v705_v3  ;;  %v121_v24 = vadd.s32 184, %v705_v3  ;;  %vm184_vm9 = vcmp.eq.s32.totalorder %v124_v18, %v709_v5 }
  0x30   :  { %544 = vmatpush.msk.msra.mxu2 %vm155_vm15, %v674_v14  ;;  %560 = vmatpush.msk.msra.mxu3 %vm187_vm0, %v674_v14  ;;  %vm150_vm10 = vcmp.eq.s32.totalorder %v107_v19, %v709_v5  ;;  %vm149_vm11 = vcmp.eq.s32.totalorder %v106_v21, %v707_v4  ;;  %vm181_vm12 = vcmp.eq.s32.totalorder %v122_v22, %v707_v4  ;;  %v104_v25 = vadd.s32 48, %v705_v3 }
  0x31   :  { %527 = vmatpush.msk.msra.mxu1 %vm188_vm1, %v674_v14  ;;  %512 = vmatpush.msk.msra.mxu0 %vm154_vm2, %v674_v14  ;;  %v120_v26 = vadd.s32 176, %v705_v3  ;;  %vm182_vm13 = vcmp.eq.s32.totalorder %v123_v20, %v709_v5  ;;  %vm148_vm14 = vcmp.eq.s32.totalorder %v106_v21, %v709_v5  ;;  %vm147_vm15 = vcmp.eq.s32.totalorder %v105_v23, %v707_v4 }
  0x32   :  { %545 = vmatpush.msk.msra.mxu2 %vm153_vm3, %v674_v14  ;;  %561 = vmatpush.msk.msra.mxu3 %vm185_vm4, %v674_v14  ;;  %vm179_vm0 = vcmp.eq.s32.totalorder %v121_v24, %v707_v4  ;;  %v103_v27 = vadd.s32 40, %v705_v3  ;;  %v119_v28 = vadd.s32 168, %v705_v3  ;;  %vm180_vm1 = vcmp.eq.s32.totalorder %v122_v22, %v709_v5 }
  0x33   :  { %528 = vmatpush.msk.msra.mxu1 %vm186_vm5, %v674_v14  ;;  %513 = vmatpush.msk.msra.mxu0 %vm152_vm6, %v674_v14  ;;  %vm146_vm2 = vcmp.eq.s32.totalorder %v105_v23, %v709_v5  ;;  %vm145_vm3 = vcmp.eq.s32.totalorder %v104_v25, %v707_v4  ;;  %vm177_vm4 = vcmp.eq.s32.totalorder %v120_v26, %v707_v4  ;;  %v102_v29 = vadd.s32 32, %v705_v3 }
  0x34   :  { %546 = vmatpush.msk.msra.mxu2 %vm151_vm7, %v674_v14  ;;  %562 = vmatpush.msk.msra.mxu3 %vm183_vm8, %v674_v14  ;;  %v118_v30 = vadd.s32 160, %v705_v3  ;;  %vm178_vm5 = vcmp.eq.s32.totalorder %v121_v24, %v709_v5  ;;  %vm144_vm6 = vcmp.eq.s32.totalorder %v104_v25, %v709_v5  ;;  %vm143_vm7 = vcmp.eq.s32.totalorder %v103_v27, %v707_v4 }
  0x35   :  { %529 = vmatpush.msk.msra.mxu1 %vm184_vm9, %v674_v14  ;;  %514 = vmatpush.msk.msra.mxu0 %vm150_vm10, %v674_v14  ;;  %vm175_vm8 = vcmp.eq.s32.totalorder %v119_v28, %v707_v4  ;;  %v101_v31 = vadd.s32 24, %v705_v3  ;;  %v117_v32 = vadd.s32 152, %v705_v3  ;;  %vm176_vm9 = vcmp.eq.s32.totalorder %v120_v26, %v709_v5 }
  0x36   :  { %547 = vmatpush.msk.msra.mxu2 %vm149_vm11, %v674_v14  ;;  %563 = vmatpush.msk.msra.mxu3 %vm181_vm12, %v674_v14  ;;  %vm142_vm10 = vcmp.eq.s32.totalorder %v103_v27, %v709_v5  ;;  %vm141_vm11 = vcmp.eq.s32.totalorder %v102_v29, %v707_v4  ;;  %vm173_vm12 = vcmp.eq.s32.totalorder %v118_v30, %v707_v4  ;;  %v100_v33 = vadd.s32 16, %v705_v3 }
  0x37   :  { %530 = vmatpush.msk.msra.mxu1 %vm182_vm13, %v674_v14  ;;  %515 = vmatpush.msk.msra.mxu0 %vm148_vm14, %v674_v14  ;;  %v116_v34 = vadd.s32 144, %v705_v3  ;;  %vm174_vm13 = vcmp.eq.s32.totalorder %v119_v28, %v709_v5  ;;  %vm140_vm14 = vcmp.eq.s32.totalorder %v102_v29, %v709_v5  ;;  %v99_v35 = vadd.s32 8, %v705_v3 }
  0x38   :  { %548 = vmatpush.msk.msra.mxu2 %vm147_vm15, %v674_v14  ;;  %564 = vmatpush.msk.msra.mxu3 %vm179_vm0, %v674_v14  ;;  %vm139_vm15 = vcmp.eq.s32.totalorder %v101_v31, %v707_v4  ;;  %vm171_vm0 = vcmp.eq.s32.totalorder %v117_v32, %v707_v4  ;;  %v115_v36 = vadd.s32 136, %v705_v3  ;;  %v114_v37 = vadd.s32 128, %v705_v3 }
  0x39   :  { %531 = vmatpush.msk.msra.mxu1 %vm180_vm1, %v674_v14  ;;  %516 = vmatpush.msk.msra.mxu0 %vm146_vm2, %v674_v14  ;;  %vm172_vm1 = vcmp.eq.s32.totalorder %v118_v30, %v709_v5  ;;  %vm138_vm2 = vcmp.eq.s32.totalorder %v101_v31, %v709_v5 }
  0x3a   :  { %549 = vmatpush.msk.msra.mxu2 %vm145_vm3, %v674_v14  ;;  %565 = vmatpush.msk.msra.mxu3 %vm177_vm4, %v674_v14  ;;  %vm137_vm3 = vcmp.eq.s32.totalorder %v100_v33, %v707_v4  ;;  %vm169_vm4 = vcmp.eq.s32.totalorder %v116_v34, %v707_v4 }
  0x3b   :  { %532 = vmatpush.msk.msra.mxu1 %vm178_vm5, %v674_v14  ;;  %517 = vmatpush.msk.msra.mxu0 %vm144_vm6, %v674_v14  ;;  %vm170_vm5 = vcmp.eq.s32.totalorder %v117_v32, %v709_v5  ;;  %vm136_vm6 = vcmp.eq.s32.totalorder %v100_v33, %v709_v5 }
  0x3c   :  { %550 = vmatpush.msk.msra.mxu2 %vm143_vm7, %v674_v14  ;;  %566 = vmatpush.msk.msra.mxu3 %vm175_vm8, %v674_v14  ;;  %vm135_vm7 = vcmp.eq.s32.totalorder %v99_v35, %v707_v4  ;;  %vm167_vm8 = vcmp.eq.s32.totalorder %v115_v36, %v707_v4 }
  0x3d   :  { %533 = vmatpush.msk.msra.mxu1 %vm176_vm9, %v674_v14  ;;  %518 = vmatpush.msk.msra.mxu0 %vm142_vm10, %v674_v14  ;;  %vm168_vm9 = vcmp.eq.s32.totalorder %v116_v34, %v709_v5  ;;  %vm134_vm10 = vcmp.eq.s32.totalorder %v99_v35, %v709_v5 }
  0x3e   :  { %551 = vmatpush.msk.msra.mxu2 %vm141_vm11, %v674_v14  ;;  %567 = vmatpush.msk.msra.mxu3 %vm173_vm12, %v674_v14  ;;  %vm133_vm11 = vcmp.eq.s32.totalorder %v705_v3, %v707_v4  ;;  %vm165_vm12 = vcmp.eq.s32.totalorder %v114_v37, %v707_v4 }
  0x3f   :  { %534 = vmatpush.msk.msra.mxu1 %vm174_vm13, %v674_v14  ;;  %519 = vmatpush.msk.msra.mxu0 %vm140_vm14, %v674_v14  ;;  %vm166_vm13 = vcmp.eq.s32.totalorder %v115_v36, %v709_v5  ;;  %vm132_vm14 = vcmp.eq.s32.totalorder %v705_v3, %v709_v5 }
  0x40   :  { %552 = vmatpush.msk.msra.mxu2 %vm139_vm15, %v674_v14  ;;  %568 = vmatpush.msk.msra.mxu3 %vm171_vm0, %v674_v14  ;;  %vm164_vm15 = vcmp.eq.s32.totalorder %v114_v37, %v709_v5 }
  0x41   :  { %535 = vmatpush.msk.msra.mxu1 %vm172_vm1, %v674_v14  ;;  %520 = vmatpush.msk.msra.mxu0 %vm138_vm2, %v674_v14 }
  0x42   :  { %553 = vmatpush.msk.msra.mxu2 %vm137_vm3, %v674_v14  ;;  %569 = vmatpush.msk.msra.mxu3 %vm169_vm4, %v674_v14 }
  0x43   :  { %536 = vmatpush.msk.msra.mxu1 %vm170_vm5, %v674_v14  ;;  %521 = vmatpush.msk.msra.mxu0 %vm136_vm6, %v674_v14 }
  0x44   :  { %554 = vmatpush.msk.msra.mxu2 %vm135_vm7, %v674_v14  ;;  %570 = vmatpush.msk.msra.mxu3 %vm167_vm8, %v674_v14 }
  0x45   :  { %537 = vmatpush.msk.msra.mxu1 %vm168_vm9, %v674_v14  ;;  %522 = vmatpush.msk.msra.mxu0 %vm134_vm10, %v674_v14 }
  0x46   :  { %555 = vmatpush.msk.msra.mxu2 %vm133_vm11, %v674_v14  ;;  %571 = vmatpush.msk.msra.mxu3 %vm165_vm12, %v674_v14 }
  0x47   :  { %384 = vmatmul.f32.vlgmr.msra.gmra.mxu2 %v326_v38  ;;  %404 = vmatmul.f32.vlgmr.msra.gmra.mxu3 %v327_v39 }
  0x48   :  { %538 = vmatpush.msk.msra.mxu1 %vm166_vm13, %v674_v14  ;;  %523 = vmatpush.msk.msra.mxu0 %vm132_vm14, %v674_v14 }
  0x49   :  { %344 = vmatmul.f32.vlgmr.msra.gmra.mxu0 %v326_v38 }
  0x4a   :  { %539 = vmatpush.msk.msra.mxu1 %vm164_vm15, %v674_v14 }
  0x4b   :  { %364 = vmatmul.f32.vlgmr.msra.gmra.mxu1 %v327_v39 }
  0xc6   :  { %v345_v40 = vpop.f32.mrf.mxu0 }
  0xc8   :  { %v365_v42 = vpop.f32.mrf.mxu1 }
  0xc9   :  { %v366_v43 = vadd.f32 %v365_v42, %v345_v40 }
  0xca   :  { %v385_v44 = vpop.f32.mrf.mxu2  ;;  %v405_v46 = vpop.f32.mrf.mxu3 }
  0xcb   :  { %v408_v47 = vadd.f32 %v366_v43, %v324_v41  ;;  %v406_v48 = vadd.f32 %v405_v46, %v385_v44 }
  0xcd   :  { %410 = vst [vmem:[#allocation9] sm:$0xff] %v408_v47  ;;  %v409_v49 = vadd.f32 %v406_v48, %v325_v45 }
  0xcf   :  { %411 = vst [vmem:[#allocation9 + $0x8] sm:$0xff] %v409_v49 }
  0xd0 PF:  { %s419_s27 = sshll.u32 %s882_s3, 4  ;;  %s675_s28 = smov [#allocation9]   ;;  %s420_s27 = int_to_ptr.hbm [resolvable:$true] %s419_s27 }
  0xd1   :  { %s417_s29 = sshll.u32 %s675_s28, 4  ;;  %s418_s29 = int_to_ptr.vmem [resolvable:$true] %s417_s29 }
  0xd2   :  { %422 = dma.vmem_to_hbm [thread:$0]  %s418_s29, 256, %s420_s27, [#allocation6]  }
  0xd3   :  { %668 = dma.done.wait [#allocation6], 256  }
  0xd4   :  { %669 = vsyncadd [#allocation6], 4294967040 }
  0xd5   :  { %427 = vsyncpa [#allocation5], 1 }
  0xd6   :  { %428 = vsyncpa [#allocation8], 1 }
  0xd7   :  { %429 = vsyncpa [#allocation6], 1 }

</bundles_post_ra>
